<compile_context>
chip_gen: v6e
topology: v6e:2x2x1
jax: 0.10.0
libtpu: 0.0.40
codegen_flags: <defaults>
</compile_context>

<pallas_src>
import jax
import jax.numpy as jnp
from jax.experimental import pallas as pl
from jax.experimental.pallas import tpu as pltpu


def _round_up(a: int, b: int) -> int:
    return (a + b - 1) // b * b


def _pick_tn(dim_p: int, target: int) -> int:
    """Largest multiple-of-128 divisor of dim_p that is <= target."""
    if dim_p <= target:
        return dim_p
    best = 128
    t = 256
    while t <= target:
        if dim_p % t == 0:
            best = t
        t += 128
    return best


def _vmem_capacity_bytes() -> int:
    try:
        return int(pltpu.get_tpu_info().vmem_capacity_bytes)
    except Exception:
        return 64 * 1024 * 1024   # conservative default (v7x per-core VMEM)


def glu_kernel(x_ref, w_ref, b_ref, o_ref):
    # x_ref: (tm, dim_p)       matmul dtype (bf16 by default)
    # w_ref: (dim_p, 2*tn)     fused [W_a_block | W_g_block], matmul dtype
    # b_ref: (1, 2*tn)         fused [b_a_block | b_g_block], f32
    # o_ref: (tm, tn)
    y = jnp.dot(x_ref[...], w_ref[...],
                preferred_element_type=jnp.float32) + b_ref[...]
    tn = y.shape[-1] // 2              # static; multiple of 128 -> free lane slice
    a = y[:, :tn]
    g = y[:, tn:]
    # Elementwise epilogue stays f32 (v5e has no bf16 VPU/EUP); cast at store.
    o_ref[...] = (a * jax.nn.sigmoid(g)).astype(o_ref.dtype)


def glu_forward(x, weight, bias, *, tm=512, tn=512, matmul_dtype=jnp.bfloat16):
    """GLU forward.

    x:      (B, S, dim)
    weight: (2*dim, dim)   -- PyTorch nn.Linear(dim, 2*dim) weight layout
    bias:   (2*dim,)
    """
    B, S, dim = x.shape
    assert weight.shape == (2 * dim, dim)
    assert bias.shape == (2 * dim,)

    out_dtype = x.dtype
    M = B * S
    dim_p = _round_up(dim, 128)

    # --- tile-size selection under an explicit VMEM budget -------------------
    mm_bytes = jnp.dtype(matmul_dtype).itemsize
    out_bytes = jnp.dtype(out_dtype).itemsize

    tm_eff = min(tm, _round_up(M, 8))
    tn_eff = _pick_tn(dim_p, tn)

    def vmem_estimate(tm_, tn_):
        return (2 * tm_ * dim_p * mm_bytes        # x block, double-buffered
                + 2 * dim_p * 2 * tn_ * mm_bytes  # fused W block, double-buffered
                + 2 * 2 * tn_ * 4                 # fused bias block (f32)
                + 2 * tm_ * tn_ * out_bytes       # output block, double-buffered
                + tm_ * 2 * tn_ * 4)              # f32 matmul result

    vmem_cap = _vmem_capacity_bytes()
    budget = int(0.55 * vmem_cap)
    for _ in range(8):
        if vmem_estimate(tm_eff, tn_eff) <= budget:
            break
        if tn_eff > 128:
            tn_eff = _pick_tn(dim_p, max(128, tn_eff // 2))
        elif tm_eff > 8:
            tm_eff = max(8, (tm_eff // 2) // 8 * 8)
        else:
            break

    M_pad = _round_up(M, tm_eff)
    grid_m = M_pad // tm_eff
    grid_n = dim_p // tn_eff

    vmem_limit = int(min(max(2 * vmem_estimate(tm_eff, tn_eff),
                             32 * 1024 * 1024),
                         0.8 * vmem_cap))

    # --- wrapper glue: pad, split, transpose, re-pack the parameters ---------
    x2d = x.reshape(M, dim)
    x2d = jnp.pad(x2d, ((0, M_pad - M), (0, dim_p - dim))).astype(matmul_dtype)

    w_a = jnp.pad(weight[:dim, :].T, ((0, dim_p - dim), (0, dim_p - dim)))
    w_g = jnp.pad(weight[dim:, :].T, ((0, dim_p - dim), (0, dim_p - dim)))
    w_a = w_a.astype(matmul_dtype)
    w_g = w_g.astype(matmul_dtype)
    # Interleave per output-column block so each grid-n tile is one contiguous
    # (dim_p, 2*tn) slab: [Wa_n | Wg_n].
    w_fused = jnp.concatenate(
        [w_a.reshape(dim_p, grid_n, tn_eff),
         w_g.reshape(dim_p, grid_n, tn_eff)], axis=2).reshape(dim_p, 2 * dim_p)

    b_a = jnp.pad(bias[:dim], (0, dim_p - dim)).astype(jnp.float32)
    b_g = jnp.pad(bias[dim:], (0, dim_p - dim)).astype(jnp.float32)
    b_fused = jnp.concatenate(
        [b_a.reshape(grid_n, tn_eff),
         b_g.reshape(grid_n, tn_eff)], axis=1).reshape(1, 2 * dim_p)

    cost = pl.CostEstimate(
        flops=2 * M_pad * dim_p * 2 * dim_p,
        transcendentals=M_pad * dim_p,
        bytes_accessed=(grid_n * M_pad * dim_p * mm_bytes   # x re-read per N block
                        + dim_p * 2 * dim_p * mm_bytes      # weights read once
                        + 2 * dim_p * 4                     # bias
                        + M_pad * dim_p * out_bytes))       # output

    out2d = pl.pallas_call(
        glu_kernel,
        out_shape=jax.ShapeDtypeStruct((M_pad, dim_p), out_dtype),
        grid_spec=pltpu.PrefetchScalarGridSpec(
            num_scalar_prefetch=0,
            # N (output columns) outer, M (rows) inner: the weight block stays
            # resident across the whole M sweep.
            grid=(grid_n, grid_m),
            in_specs=[
                pl.BlockSpec((tm_eff, dim_p), lambda n, m: (m, 0)),       # x rows
                pl.BlockSpec((dim_p, 2 * tn_eff), lambda n, m: (0, n)),   # fused W
                pl.BlockSpec((1, 2 * tn_eff), lambda n, m: (0, n)),       # fused bias
            ],
            out_specs=pl.BlockSpec((tm_eff, tn_eff), lambda n, m: (m, n)),
        ),
        compiler_params=pltpu.CompilerParams(
            dimension_semantics=("parallel", "parallel"),
            vmem_limit_bytes=vmem_limit),
        cost_estimate=cost,
    )(x2d, w_fused, b_fused)

    return out2d[:M, :dim].reshape(B, S, dim)


def glu_reference(x, weight, bias):
    """Pure-JAX reference matching the PyTorch forward."""
    y = jnp.einsum("bsd,od->bso", x, weight) + bias
    dim = x.shape[-1]
    return y[..., :dim] * jax.nn.sigmoid(y[..., dim:])


if __name__ == "__main__":
    def make_inputs(key, B, S, dim):
        kx, kw, kb = jax.random.split(key, 3)
        x = jax.random.normal(kx, (B, S, dim), dtype=jnp.float32)
        weight = jax.random.normal(kw, (2 * dim, dim), dtype=jnp.float32) * 0.1
        bias = jax.random.normal(kb, (2 * dim,), dtype=jnp.float32) * 0.1
        return x, weight, bias

    def round_bf16(a):
        return a.astype(jnp.bfloat16).astype(jnp.float32)

    # Base shapes consistent with the module: (batch=2, seq=8, dim=32).
    x, w, b = make_inputs(jax.random.PRNGKey(0), 2, 8, 32)

    # f32 matmul path: tight check against the f32 reference.
    out_f32 = jax.block_until_ready(glu_forward(x, w, b, matmul_dtype=jnp.float32))
    ref_f32 = glu_reference(x, w, b)
    assert out_f32.shape == (2, 8, 32)
    assert jnp.allclose(out_f32, ref_f32, atol=1e-5, rtol=1e-5), "f32 path mismatch"

    # Default bf16-matmul path: compare against a reference fed bf16-rounded
    # operands (residual difference is only accumulation order / sigmoid impl).
    out_bf = jax.block_until_ready(glu_forward(x, w, b))
    ref_bf = glu_reference(round_bf16(x), round_bf16(w), b)
    assert jnp.allclose(out_bf, ref_bf, atol=1e-2, rtol=1e-2), "bf16 path mismatch"

    # Exercise zero-padding of both M (33 -> 40) and dim (200 -> 256).
    x2, w2, b2 = make_inputs(jax.random.PRNGKey(1), 3, 11, 200)
    o2 = jax.block_until_ready(glu_forward(x2, w2, b2))
    r2 = glu_reference(round_bf16(x2), round_bf16(w2), b2)
    assert o2.shape == (3, 11, 200)
    assert jnp.allclose(o2, r2, atol=1e-2, rtol=1e-2), "padded-shape mismatch"

    # Exercise a multi-block grid: grid_n = 5 (dim=640), grid_m = 2 (M=600).
    x3, w3, b3 = make_inputs(jax.random.PRNGKey(2), 2, 300, 640)
    o3 = jax.block_until_ready(glu_forward(x3, w3, b3))
    r3 = glu_reference(round_bf16(x3), round_bf16(w3), b3)
    assert o3.shape == (2, 300, 640)
    assert jnp.allclose(o3, r3, atol=1e-2, rtol=1e-2), "multi-block grid mismatch"

    print("KERNEL_OK")
</pallas_src>

<mosaic_0001>
module attributes {stable_mosaic.version = 11 : i64} {
  func.func @glu_kernel(%arg0: i32, %arg1: i32, %arg2: memref<16x128xf32, #tpu.memory_space<vmem>>, %arg3: memref<128x256xf32, #tpu.memory_space<vmem>>, %arg4: memref<1x256xf32, #tpu.memory_space<vmem>>, %arg5: memref<16x128xf32, #tpu.memory_space<vmem>>) attributes {dimension_semantics = [#tpu.dimension_semantics<parallel>, #tpu.dimension_semantics<parallel>], iteration_bounds = array<i64: 1, 1>, scalar_prefetch = 0 : i64, scratch_operands = 0 : i64, tpu.core_type = #tpu.core_type<tc>, window_params = [{transform_indices = @transform_0, window_bounds = array<i64: 16, 128>}, {transform_indices = @transform_1, window_bounds = array<i64: 128, 256>}, {transform_indices = @transform_2, window_bounds = array<i64: 1, 256>}, {transform_indices = @transform_3, window_bounds = array<i64: 16, 128>}]} {
    %c0 = arith.constant 0 : index
    %c0_0 = arith.constant 0 : index
    %0 = vector.load %arg2[%c0, %c0_0] : memref<16x128xf32, #tpu.memory_space<vmem>>, vector<16x128xf32>
    %c0_1 = arith.constant 0 : index
    %c0_2 = arith.constant 0 : index
    %1 = vector.load %arg3[%c0_1, %c0_2] : memref<128x256xf32, #tpu.memory_space<vmem>>, vector<128x256xf32>
    %cst = arith.constant dense<0.000000e+00> : vector<16x256xf32>
    %2 = tpu.matmul %0, %1, %cst {dimension_numbers = #tpu.dot_dimension_numbers<[1], [0], [0], [1], [0, 0, 1, 1], [], []>} : vector<16x128xf32>, vector<128x256xf32>, vector<16x256xf32> -> vector<16x256xf32>
    %c0_3 = arith.constant 0 : index
    %c0_4 = arith.constant 0 : index
    %3 = vector.load %arg4[%c0_3, %c0_4] : memref<1x256xf32, #tpu.memory_space<vmem>>, vector<1x256xf32>
    %4 = vector.broadcast %3 : vector<1x256xf32> to vector<16x256xf32>
    %5 = arith.addf %2, %4 : vector<16x256xf32>
    %6 = vector.extract_strided_slice %5 {offsets = [0, 0], sizes = [16, 128], strides = [1, 1]} : vector<16x256xf32> to vector<16x128xf32>
    %7 = vector.extract_strided_slice %5 {offsets = [0, 128], sizes = [16, 128], strides = [1, 1]} : vector<16x256xf32> to vector<16x128xf32>
    %8 = arith.negf %7 : vector<16x128xf32>
    %9 = math.exp %8 : vector<16x128xf32>
    %cst_5 = arith.constant 1.000000e+00 : f32
    %10 = vector.broadcast %cst_5 : f32 to vector<16x128xf32>
    %11 = arith.addf %10, %9 : vector<16x128xf32>
    %12 = arith.divf %10, %11 : vector<16x128xf32>
    %13 = arith.mulf %6, %12 : vector<16x128xf32>
    %c0_6 = arith.constant 0 : index
    %c0_7 = arith.constant 0 : index
    %14 = vector.load %arg5[%c0_6, %c0_7] : memref<16x128xf32, #tpu.memory_space<vmem>>, vector<16x128xf32>
    tpu.vector_store %arg5[%c0_6, %c0_7], %13 {strides = array<i32>} : memref<16x128xf32, #tpu.memory_space<vmem>>, vector<16x128xf32>,
    return
  }
  func.func @transform_0(%arg0: i32, %arg1: i32) -> (i32, i32) {
    %c0_i32 = arith.constant 0 : i32
    %c0_i32_0 = arith.constant 0 : i32
    return %arg1, %c0_i32 : i32, i32
  }
  func.func @transform_1(%arg0: i32, %arg1: i32) -> (i32, i32) {
    %c0_i32 = arith.constant 0 : i32
    %c0_i32_0 = arith.constant 0 : i32
    return %c0_i32, %arg0 : i32, i32
  }
  func.func @transform_2(%arg0: i32, %arg1: i32) -> (i32, i32) {
    %c0_i32 = arith.constant 0 : i32
    %c0_i32_0 = arith.constant 0 : i32
    return %c0_i32, %arg0 : i32, i32
  }
  func.func @transform_3(%arg0: i32, %arg1: i32) -> (i32, i32) {
    %c0_i32 = arith.constant 0 : i32
    return %arg1, %arg0 : i32, i32
  }
}

</mosaic_0001>

<bundles_post_ra>
// kernel: tpu_custom_call.1
= control target key start
LH: loop header
LB: loop body
LE: loop exit
PB: predicated region body
PF: predicated region fallthrough
CT: control target
= control target key end

     0   :  { %8 = vsyncpa [#allocation3], 0  ;;  %s362_s0 = inlined_call_operand.hbm [shape: f32[16,128], index: 0, kind: input, shape index: {}]   ;;  %s363_s1 = inlined_call_operand.hbm [shape: f32[128,256], index: 1, kind: input, shape index: {}]   ;;  %s364_s2 = inlined_call_operand.vmem [shape: f32[1,256], index: 2, kind: input, shape index: {}]   ;;  %s365_s3 = inlined_call_operand.hbm [shape: f32[16,128], index: 3, kind: output, shape index: {}]  }
   0x1   :  { %9 = vsyncpa [#allocation6], 0 }
   0x2   :  { %10 = vsyncpa [#allocation4], 0  ;;  %s316_s12 = smov [#allocation2]  }
   0x3   :  { %s16_s13 = sshll.u32 %s316_s12, 4  ;;  %s17_s13 = int_to_ptr.vmem [resolvable:$true] %s16_s13 }
   0x4   :  { %s258_s14 = scalar_lea.vmem %s17_s13, 256  ;;  %p263_p1 = scmp.lt.s32.totalorder %s17_s13, %s17_s13 }
   0x5   :  { %p259_p0 = scmp.ne.s32.totalorder %s17_s13, %s258_s14  ;;  %p264_p2 = scmp.lt.s32.totalorder %s258_s14, %s258_s14 }
   0x7   :  { %p265_p3 = por %p264_p2, %p263_p1 }
   0x9   :  { %p266_p4 = pnand %p265_p3, %p259_p0 }
   0xb   :  { %269 = shalt.err (!%p266_p4)
}
   0xc   :  { %s317_s15 = smov 128   ;;  %s318_s16 = smov 8  }
   0xd   :  { %22 = dma.hbm_to_vmem [thread:$0]  %s362_s0, 256, %s17_s13, [#allocation3], %s317_s15, %s317_s15, %s318_s16  }
   0xe   :  { %s319_s19 = smov [#allocation5]  }
   0xf   :  { %s28_s20 = sshll.u32 %s319_s19, 4  ;;  %s29_s20 = int_to_ptr.vmem [resolvable:$true] %s28_s20 }
  0x10   :  { %s278_s21 = scalar_lea.vmem %s29_s20, 4096  ;;  %p283_p6 = scmp.lt.s32.totalorder %s29_s20, %s29_s20 }
  0x11   :  { %p279_p5 = scmp.ne.s32.totalorder %s29_s20, %s278_s21  ;;  %p284_p7 = scmp.lt.s32.totalorder %s278_s21, %s278_s21 }
  0x13   :  { %p285_p8 = por %p284_p7, %p283_p6 }
  0x15   :  { %p286_p9 = pnand %p285_p8, %p279_p5 }
  0x17   :  { %289 = shalt.err (!%p286_p9)
}
  0x18   :  { %s320_s22 = smov 256   ;;  %s321_s23 = smov 16  }
  0x19   :  { %34 = dma.hbm_to_vmem [thread:$0]  %s363_s1, 4096, %s29_s20, [#allocation6], %s320_s22, %s320_s22, %s321_s23  }
  0x1a   :  { %310 = dma.done.wait [#allocation3], 256  }
  0x1b   :  { %311 = vsyncadd [#allocation3], 4294967040 }
  0x1c   :  { %312 = dma.done.wait [#allocation6], 4096  }
  0x1d   :  { %313 = vsyncadd [#allocation6], 4294963200  ;;  %v322_v0 = vmov 0.0   ;;  %v76_v1 = vld [vmem:[#allocation5 + $0xf8] sm:$0xff]  ;;  %v75_v2 = vld [vmem:[#allocation5 + $0xf0] sm:$0xff]  ;;  %v79_v35 = vlaneseq }
  0x1e   :  { %153 = vmatprep.mubr.f32.mxu0 %v322_v0  ;;  %159 = vmatprep.mubr.f32.mxu1 %v322_v0  ;;  %v74_v3 = vld [vmem:[#allocation5 + $0xe8] sm:$0xff]  ;;  %v73_v4 = vld [vmem:[#allocation5 + $0xe0] sm:$0xff]  ;;  %v72_v5 = vld [vmem:[#allocation5 + $0xd8] sm:$0xff] }
  0x1f   :  { %89 = vmatprep.subr.mxu0 %v76_v1  ;;  %202 = vmatprep.subr.mxu1 %v76_v1  ;;  %v71_v6 = vld [vmem:[#allocation5 + $0xd0] sm:$0xff]  ;;  %v70_v7 = vld [vmem:[#allocation5 + $0xc8] sm:$0xff]  ;;  %v69_v8 = vld [vmem:[#allocation5 + $0xc0] sm:$0xff]  ;;  %v80_v36 = vshrl.u32 %v79_v35, 7 }
  0x20   :  { %90 = vmatpush1.msra.mxu0 %v75_v2  ;;  %218 = vmatpush1.msra.mxu1 %v75_v2  ;;  %v68_v9 = vld [vmem:[#allocation5 + $0xb8] sm:$0xff]  ;;  %v67_v10 = vld [vmem:[#allocation5 + $0xb0] sm:$0xff]  ;;  %v66_v11 = vld [vmem:[#allocation5 + $0xa8] sm:$0xff] }
  0x21   :  { %91 = vmatprep.subr.mxu0 %v74_v3  ;;  %203 = vmatprep.subr.mxu1 %v74_v3  ;;  %v65_v12 = vld [vmem:[#allocation5 + $0xa0] sm:$0xff]  ;;  %v64_v13 = vld [vmem:[#allocation5 + $0x98] sm:$0xff]  ;;  %v63_v14 = vld [vmem:[#allocation5 + $0x90] sm:$0xff]  ;;  %v85_v37 = vsub.s32 1, %v80_v36  ;;  %v81_v52 = vsub.s32 0, %v80_v36 }
  0x22   :  { %92 = vmatpush1.msra.mxu0 %v73_v4  ;;  %219 = vmatpush1.msra.mxu1 %v73_v4  ;;  %v62_v15 = vld [vmem:[#allocation5 + $0x88] sm:$0xff]  ;;  %v61_v16 = vld [vmem:[#allocation5 + $0x80] sm:$0xff]  ;;  %v60_v17 = vld [vmem:[#allocation5 + $0x78] sm:$0xff] }
  0x23   :  { %93 = vmatprep.subr.mxu0 %v72_v5  ;;  %204 = vmatprep.subr.mxu1 %v72_v5  ;;  %v59_v18 = vld [vmem:[#allocation5 + $0x70] sm:$0xff]  ;;  %v58_v19 = vld [vmem:[#allocation5 + $0x68] sm:$0xff]  ;;  %v57_v20 = vld [vmem:[#allocation5 + $0x60] sm:$0xff] }
  0x24   :  { %94 = vmatpush1.msra.mxu0 %v71_v6  ;;  %220 = vmatpush1.msra.mxu1 %v71_v6  ;;  %v56_v21 = vld [vmem:[#allocation5 + $0x58] sm:$0xff]  ;;  %v55_v22 = vld [vmem:[#allocation5 + $0x50] sm:$0xff]  ;;  %v54_v23 = vld [vmem:[#allocation5 + $0x48] sm:$0xff] }
  0x25   :  { %95 = vmatprep.subr.mxu0 %v70_v7  ;;  %205 = vmatprep.subr.mxu1 %v70_v7  ;;  %v53_v24 = vld [vmem:[#allocation5 + $0x40] sm:$0xff]  ;;  %v52_v25 = vld [vmem:[#allocation5 + $0x38] sm:$0xff]  ;;  %v51_v26 = vld [vmem:[#allocation5 + $0x30] sm:$0xff] }
  0x26   :  { %96 = vmatpush1.msra.mxu0 %v69_v8  ;;  %221 = vmatpush1.msra.mxu1 %v69_v8  ;;  %v50_v27 = vld [vmem:[#allocation5 + $0x28] sm:$0xff]  ;;  %v49_v28 = vld [vmem:[#allocation5 + $0x20] sm:$0xff]  ;;  %v48_v29 = vld [vmem:[#allocation5 + $0x18] sm:$0xff] }
  0x27   :  { %97 = vmatprep.subr.mxu0 %v68_v9  ;;  %206 = vmatprep.subr.mxu1 %v68_v9  ;;  %v47_v30 = vld [vmem:[#allocation5 + $0x10] sm:$0xff]  ;;  %v46_v31 = vld [vmem:[#allocation5 + $0x8] sm:$0xff]  ;;  %v45_v32 = vld [vmem:[#allocation5] sm:$0xff] }
  0x28   :  { %98 = vmatpush1.msra.mxu0 %v67_v10  ;;  %222 = vmatpush1.msra.mxu1 %v67_v10  ;;  %v43_v33 = vld [vmem:[#allocation2] sm:$0xff]  ;;  %v44_v34 = vld [vmem:[#allocation2 + $0x8] sm:$0xff] }
  0x29   :  { %99 = vmatprep.subr.mxu0 %v66_v11  ;;  %207 = vmatprep.subr.mxu1 %v66_v11  ;;  %v77_v38 = vld [vmem:[%s364_s2] sm:$0x3]  ;;  %s323_s2 = smov [#allocation7]  }
  0x2a   :  { %100 = vmatpush1.msra.mxu0 %v65_v12  ;;  %223 = vmatpush1.msra.mxu1 %v65_v12  ;;  %v86_v39 = vrot.slane %v77_v38, %v85_v37  ;;  %v82_v53 = vrot.slane %v77_v38, %v81_v52  ;;  %s187_s26 = sshll.u32 %s323_s2, 4  ;;  %s188_s26 = int_to_ptr.vmem [resolvable:$true] %s187_s26 }
  0x2b   :  { %101 = vmatprep.subr.mxu0 %v64_v13  ;;  %208 = vmatprep.subr.mxu1 %v64_v13  ;;  %s290_s27 = scalar_lea.vmem %s188_s26, 256  ;;  %p295_p11 = scmp.lt.s32.totalorder %s188_s26, %s188_s26 }
  0x2c   :  { %102 = vmatpush1.msra.mxu0 %v63_v14  ;;  %224 = vmatpush1.msra.mxu1 %v63_v14  ;;  %p291_p10 = scmp.ne.s32.totalorder %s188_s26, %s290_s27  ;;  %p296_p12 = scmp.lt.s32.totalorder %s290_s27, %s290_s27 }
  0x2d   :  { %103 = vmatprep.subr.mxu0 %v62_v15  ;;  %209 = vmatprep.subr.mxu1 %v62_v15 }
  0x2e   :  { %104 = vmatpush1.msra.mxu0 %v61_v16  ;;  %225 = vmatpush1.msra.mxu1 %v61_v16  ;;  %p297_p13 = por %p296_p12, %p295_p11 }
  0x2f   :  { %105 = vmatprep.subr.mxu0 %v60_v17  ;;  %210 = vmatprep.subr.mxu1 %v60_v17 }
  0x30   :  { %106 = vmatpush1.msra.mxu0 %v59_v18  ;;  %226 = vmatpush1.msra.mxu1 %v59_v18  ;;  %p298_p0 = pnand %p297_p13, %p291_p10 }
  0x31   :  { %107 = vmatprep.subr.mxu0 %v58_v19  ;;  %211 = vmatprep.subr.mxu1 %v58_v19 }
  0x32   :  { %108 = vmatpush1.msra.mxu0 %v57_v20  ;;  %227 = vmatpush1.msra.mxu1 %v57_v20 }
  0x33   :  { %109 = vmatprep.subr.mxu0 %v56_v21  ;;  %212 = vmatprep.subr.mxu1 %v56_v21 }
  0x34   :  { %110 = vmatpush1.msra.mxu0 %v55_v22  ;;  %228 = vmatpush1.msra.mxu1 %v55_v22 }
  0x35   :  { %111 = vmatprep.subr.mxu0 %v54_v23  ;;  %213 = vmatprep.subr.mxu1 %v54_v23 }
  0x36   :  { %112 = vmatpush1.msra.mxu0 %v53_v24  ;;  %229 = vmatpush1.msra.mxu1 %v53_v24 }
  0x37   :  { %113 = vmatprep.subr.mxu0 %v52_v25  ;;  %214 = vmatprep.subr.mxu1 %v52_v25 }
  0x38   :  { %114 = vmatpush1.msra.mxu0 %v51_v26  ;;  %230 = vmatpush1.msra.mxu1 %v51_v26 }
  0x39   :  { %115 = vmatprep.subr.mxu0 %v50_v27  ;;  %215 = vmatprep.subr.mxu1 %v50_v27 }
  0x3a   :  { %116 = vmatpush1.msra.mxu0 %v49_v28  ;;  %231 = vmatpush1.msra.mxu1 %v49_v28 }
  0x3b   :  { %117 = vmatprep.subr.mxu0 %v48_v29  ;;  %216 = vmatprep.subr.mxu1 %v48_v29 }
  0x3c   :  { %118 = vmatpush1.msra.mxu0 %v47_v30  ;;  %232 = vmatpush1.msra.mxu1 %v47_v30 }
  0x3d   :  { %119 = vmatprep.subr.mxu0 %v46_v31  ;;  %217 = vmatprep.subr.mxu1 %v46_v31 }
  0x3e   :  { %120 = vmatpush1.msra.mxu0 %v45_v32  ;;  %233 = vmatpush1.msra.mxu1 %v45_v32 }
  0x3f   :  { %154 = vmatmul.mubr.f32.vlgmr.msra.gmra.mxu0 %v43_v33  ;;  %160 = vmatmul.mubr.f32.vlgmr.msra.gmra.mxu1 %v44_v34 }
  0xff   :  { %v155_v40 = vpop.f32.mrf.mxu0  ;;  %v161_v41 = vpop.f32.mrf.mxu1 }
 0x100   :  { %v156_v54 = vadd.f32 %v155_v40, %v82_v53  ;;  %v162_v56 = vadd.f32 %v161_v41, %v82_v53 }
 0x101   :  { %v157_v42 = vpop.f32.mrf.mxu0  ;;  %v163_v43 = vpop.f32.mrf.mxu1 }
 0x102   :  { %v158_v44 = vadd.f32 %v157_v42, %v86_v39  ;;  %v164_v45 = vadd.f32 %v163_v43, %v86_v39 }
 0x104   :  { %v200_v46 = vmul.f32 -1.442695, %v158_v44  ;;  %v201_v47 = vmul.f32 -1.442695, %v164_v45 }
 0x106   :  { %242 = vpow2.f32 %v200_v46 }
 0x107   :  { %244 = vpow2.f32 %v201_v47 }
 0x113   :  { %v243_v48 = vpop.eup %242 }
 0x114   :  { %v245_v49 = vpop.eup %244  ;;  %v172_v50 = vadd.f32 1.0, %v243_v48 }
 0x115   :  { %v173_v51 = vadd.f32 1.0, %v245_v49 }
 0x116   :  { %246 = vrcp.f32 %v172_v50 }
 0x117   :  { %248 = vrcp.f32 %v173_v51 }
 0x123   :  { %v247_v55 = vpop.eup %246 }
 0x124   :  { %v249_v57 = vpop.eup %248  ;;  %v178_v58 = vmul.f32 %v247_v55, %v156_v54 }
 0x125   :  { %v179_v59 = vmul.f32 %v249_v57, %v162_v56 }
 0x126   :  { %180 = vst [vmem:[#allocation7] sm:$0xff] %v178_v58 }
 0x127   :  { %181 = vst [vmem:[#allocation7 + $0x8] sm:$0xff] %v179_v59 }
 0x128   :  { %301 = shalt.err (!%p298_p0)
}
 0x129   :  { %193 = dma.vmem_to_hbm [thread:$0]  %s188_s26, 256, %s365_s3, [#allocation4], %s317_s15, %s317_s15, %s318_s16  }
 0x12a   :  { %314 = dma.done.wait [#allocation4], 256  }
 0x12b   :  { %315 = vsyncadd [#allocation4], 4294967040 }
 0x12c   :  { %197 = vsyncpa [#allocation3], 1 }
 0x12d   :  { %198 = vsyncpa [#allocation6], 1 }
 0x12e   :  { %199 = vsyncpa [#allocation4], 1 }

</bundles_post_ra>
